<compile_context>
chip_gen: v7x
topology: tpu7x:2x2x1
jax: 0.10.0
libtpu: 0.0.40
codegen_flags: <defaults>
</compile_context>

<pallas_src>
import functools

import jax
import jax.numpy as jnp
from jax.experimental import pallas as pl
from jax.experimental.pallas import tpu as pltpu

EPS = 1e-5
# MXU operand dtype: bf16 operands with f32 accumulation. Set to jnp.float32
# for a bit-closer match to the f32 PyTorch reference (escape hatch for tight
# allclose tolerances).
_MM_DTYPE = jnp.bfloat16
# HBM/VMEM dtype of the flattened input slab. bf16 keeps the full f32 exponent
# range, so the |x|>0 occupancy test only diverges for f32 subnormals
# (irrelevant for LiDAR depth values).
_SLAB_DTYPE = jnp.bfloat16
_MAX_TN = 2048   # lane-tile cap (multiple of 128); ~85-86% of HBM roofline


def _round_up(x, m):
    return (x + m - 1) // m * m


def _vmem_limit_bytes(Cin, Cout, L, TN, PADF, K_pad):
    """Size the scoped-VMEM limit from the shapes (double-buffered blocks +
    generous temporaries), floored at 32 MiB (v5e scoped default is 16 MiB)."""
    slab = 2 * Cin * L * 2                       # bf16 resident slab, 2 buffers
    wmat = 2 * Cout * K_pad * 2
    msk = 2 * 2 * TN * 4
    outb = 2 * Cout * TN * 4
    tmp = (Cin * (TN + 2 * PADF) * 4             # f32 window
           + K_pad * TN * (4 + 2)                # patch block f32 + MXU copy
           + 2 * Cout * TN * 4)                  # acc / epilogue
    est = slab + wmat + msk + outb + 4 * tmp
    return max(32 << 20, int(est) + (8 << 20))


def _geom_lidar_kernel(xflat_ref, w_ref, mask_ref, o_ref, *, W, PADF, CIN, K_PAD):
    # xflat_ref: (Cin, L)      bf16 zero-padded flat input, resident per batch
    # w_ref:     (Cout, K_PAD) BN-scale-folded taps + bias column (MXU dtype)
    # mask_ref:  (2, TN)       f32 row-edge masks (row0: dx=-1 valid, row1: dx=+1)
    # o_ref:     (Cout, TN)    output tile, flattened spatial on lanes
    Cout, TN = o_ref.shape

    t = pl.program_id(1)
    base = pl.multiple_of(t * TN, 128)           # lane-aligned tile start

    # Load tile + halo once from the bf16 slab; single upcast. The per-tap
    # (Cin, TN) rows are sublane-sparse, so the f32 build costs the same vregs
    # as bf16 while keeping proven-safe lowering for the sublane concatenate.
    win = xflat_ref[:, pl.ds(base, TN + 2 * PADF)].astype(jnp.float32)

    m = mask_ref[...]
    mask_l = m[0:1, :]            # dx = -1 invalid at w == 0
    mask_r = m[1:2, :]            # dx = +1 invalid at w == W-1

    rows = []
    for ky in range(3):
        dy = ky - 1
        for kx in range(3):
            dx = kx - 1
            off = PADF + dy * W + dx             # static offset into the window
            s = win[:, off:off + TN]             # (Cin, TN)
            if dx == -1:
                s = s * mask_l
            elif dx == 1:
                s = s * mask_r
            rows.append(s)
    rows.append(jnp.ones((1, TN), jnp.float32))  # bias row (folded BN bias)
    if K_PAD > 9 * CIN + 1:
        rows.append(jnp.zeros((K_PAD - 9 * CIN - 1, TN), jnp.float32))
    patches = jnp.concatenate(rows, axis=0).astype(w_ref.dtype)   # (K_PAD, TN)

    # 3x3 conv + folded BN scale + folded BN bias as one MXU matmul (f32 acc).
    acc = jnp.dot(w_ref[...], patches, preferred_element_type=jnp.float32)

    # ReLU epilogue (bias already inside the matmul).
    y = jnp.maximum(acc, 0.0)

    # Sparse-conv output support: keep only occupied input coordinates.
    center = win[:, PADF:PADF + TN]              # (Cin, TN) f32
    if CIN == 1:
        occ = jnp.abs(center) > 0.0
    else:
        occ = jnp.sum(jnp.abs(center), axis=0, keepdims=True) > 0.0
    o_ref[...] = jnp.where(occ, y, 0.0).astype(o_ref.dtype)


def geometry_aware_lidar_processor(x_nchw, weight, gamma, beta, run_mean, run_var,
                                   *, out_dtype=jnp.float32):
    """x_nchw: (B, Cin, H, W) f32; weight: (9, Cin, Cout), tap index = ky*3+kx.

    Returns (B, Cout, H, W) in `out_dtype` (f32 matches the PyTorch module;
    bf16 halves the dominant HBM write if downstream tolerates it).
    """
    B, Cin, H, W = x_nchw.shape
    Cout = weight.shape[-1]
    HW = H * W

    PADF = _round_up(W + 1, 128)                 # halo >= W+1, lane aligned
    TN = min(_round_up(HW, 128), _MAX_TN)        # big lane tiles, no >=2 rule
    n_t = -(-HW // TN)
    HW_slab = n_t * TN
    L = PADF + HW_slab + PADF

    K = 9 * Cin
    pack = 16 if _MM_DTYPE == jnp.bfloat16 else 8
    K_pad = _round_up(K + 1, pack)               # taps + bias row, sublane-packed

    # Flatten spatial (free for contiguous NCHW), cast to bf16, zero-pad halo.
    # TODO(synk): for Cin ~ Cout, move the padding into the kernel (pl.ANY +
    #             manual DMA) to avoid this extra HBM copy of the input.
    x_slab = jnp.pad(
        x_nchw.reshape(B, Cin, HW).astype(_SLAB_DTYPE),
        ((0, 0), (0, 0), (PADF, L - PADF - HW)))

    # Precomputed row-edge masks (replaces per-tile iota + modulo on the VPU).
    col = jnp.arange(HW_slab, dtype=jnp.int32) % W
    masks = jnp.stack([col != 0, col != W - 1], axis=0).astype(jnp.float32)

    # Fold eval-mode BatchNorm: scale into the conv taps, bias as an extra
    # matmul row (patch side supplies a constant-ones row).
    inv_std = 1.0 / jnp.sqrt(run_var.astype(jnp.float32) + EPS)
    scale = gamma.astype(jnp.float32) * inv_std                      # (Cout,)
    bias = beta.astype(jnp.float32) - run_mean.astype(jnp.float32) * scale
    w9 = (weight.astype(jnp.float32) * scale[None, None, :]).reshape(K, Cout)
    w_full = jnp.concatenate(
        [w9, bias[None, :], jnp.zeros((K_pad - K - 1, Cout), jnp.float32)], axis=0)
    w_mat = jnp.transpose(w_full, (1, 0)).astype(_MM_DTYPE)          # (Cout, K_pad)

    out_flat = pl.pallas_call(
        functools.partial(_geom_lidar_kernel, W=W, PADF=PADF, CIN=Cin, K_PAD=K_pad),
        out_shape=jax.ShapeDtypeStruct((B, Cout, HW), out_dtype),
        grid_spec=pltpu.PrefetchScalarGridSpec(
            num_scalar_prefetch=0,
            grid=(B, n_t),
            in_specs=[
                # full padded flat image, resident across the HW-tile axis
                # (for very large Cin on v7x, single-buffer via
                #  pipeline_mode=pl.Buffered(1) since it only changes with b)
                pl.BlockSpec((None, Cin, L), lambda b, t: (b, 0, 0)),
                pl.BlockSpec((Cout, K_pad), lambda b, t: (0, 0)),
                pl.BlockSpec((2, TN), lambda b, t: (0, t)),
            ],
            out_specs=pl.BlockSpec((None, Cout, TN), lambda b, t: (b, 0, t)),
        ),
        compiler_params=pltpu.CompilerParams(
            dimension_semantics=("parallel", "parallel"),
            vmem_limit_bytes=_vmem_limit_bytes(Cin, Cout, L, TN, PADF, K_pad),
        ),
    )(x_slab, w_mat, masks)

    # (B, Cout, HW) -> (B, Cout, H, W) is a free reshape (no padded-output copy).
    return out_flat.reshape(B, Cout, H, W)


if __name__ == "__main__":
    key = jax.random.PRNGKey(0)
    B, Cin, H, W, Cout = 2, 1, 16, 16, 64
    k1, k2, k3, k4, k5, k6, k7 = jax.random.split(key, 7)

    # Sparse depth map: ~25% of pixels carry a depth value, rest are zero.
    depth = jax.random.uniform(k1, (B, Cin, H, W), jnp.float32, 1.0, 80.0)
    occ_mask = (jax.random.uniform(k2, (B, 1, H, W)) < 0.25).astype(jnp.float32)
    sparse_depth = depth * occ_mask

    # Deterministic synthetic parameters (shapes from module __init__).
    weight = 0.1 * jax.random.normal(k3, (9, Cin, Cout), jnp.float32)   # 3x3 taps
    gamma = 1.0 + 0.1 * jax.random.normal(k4, (Cout,), jnp.float32)
    beta = 0.1 * jax.random.normal(k5, (Cout,), jnp.float32)
    run_mean = 0.1 * jax.random.normal(k6, (Cout,), jnp.float32)
    run_var = jnp.abs(jax.random.normal(k7, (Cout,), jnp.float32)) + 0.5

    out = geometry_aware_lidar_processor(
        sparse_depth, weight, gamma, beta, run_mean, run_var)
    out = jax.block_until_ready(out)

    assert out.shape == (B, Cout, H, W)
    # ReLU output is non-negative; unoccupied coordinates carry exact zeros.
    assert bool(jnp.all(out >= 0.0))
    unocc = jnp.sum(jnp.abs(sparse_depth), axis=1, keepdims=True) == 0.0
    assert bool(jnp.all(jnp.where(unocc, jnp.abs(out), 0.0) == 0.0))
    print("KERNEL_OK")
</pallas_src>

<mosaic_0001>
module attributes {stable_mosaic.version = 11 : i64} {
  func.func @_geom_lidar_kernel(%arg0: i32, %arg1: i32, %arg2: memref<1x1x512xbf16, #tpu.memory_space<vmem>>, %arg3: memref<64x16xbf16, #tpu.memory_space<vmem>>, %arg4: memref<2x256xf32, #tpu.memory_space<vmem>>, %arg5: memref<1x64x256xf32, #tpu.memory_space<vmem>>) attributes {dimension_semantics = [#tpu.dimension_semantics<parallel>, #tpu.dimension_semantics<parallel>], iteration_bounds = array<i64: 2, 1>, scalar_prefetch = 0 : i64, scratch_operands = 0 : i64, tpu.core_type = #tpu.core_type<tc>, window_params = [{transform_indices = @transform_0, window_bounds = array<i64: 1, 1, 512>}, {pipeline_mode = #tpu.pipeline_mode<synchronous>, transform_indices = @transform_1, window_bounds = array<i64: 64, 16>}, {transform_indices = @transform_2, window_bounds = array<i64: 2, 256>}, {transform_indices = @transform_3, window_bounds = array<i64: 1, 64, 256>}]} {
    %c256_i32 = arith.constant 256 : i32
    %0 = arith.muli %arg1, %c256_i32 : i32
    %1 = tpu.assume_multiple %0, 128 : i32
    %c0 = arith.constant 0 : index
    %c0_0 = arith.constant 0 : index
    %2 = arith.index_cast %1 : i32 to index
    %3 = vector.load %arg2[%c0, %c0_0, %2] : memref<1x1x512xbf16, #tpu.memory_space<vmem>>, vector<1x1x512xbf16>
    %4 = vector.shape_cast %3 : vector<1x1x512xbf16> to vector<1x512xbf16>
    %5 = arith.extf %4 : vector<1x512xbf16> to vector<1x512xf32>
    %c0_1 = arith.constant 0 : index
    %c0_2 = arith.constant 0 : index
    %6 = vector.load %arg4[%c0_1, %c0_2] : memref<2x256xf32, #tpu.memory_space<vmem>>, vector<2x256xf32>
    %7 = vector.extract_strided_slice %6 {offsets = [0, 0], sizes = [1, 256], strides = [1, 1]} : vector<2x256xf32> to vector<1x256xf32>
    %8 = vector.extract_strided_slice %6 {offsets = [1, 0], sizes = [1, 256], strides = [1, 1]} : vector<2x256xf32> to vector<1x256xf32>
    %9 = vector.extract_strided_slice %5 {offsets = [0, 111], sizes = [1, 256], strides = [1, 1]} : vector<1x512xf32> to vector<1x256xf32>
    %10 = arith.mulf %9, %7 : vector<1x256xf32>
    %11 = vector.extract_strided_slice %5 {offsets = [0, 112], sizes = [1, 256], strides = [1, 1]} : vector<1x512xf32> to vector<1x256xf32>
    %12 = vector.extract_strided_slice %5 {offsets = [0, 113], sizes = [1, 256], strides = [1, 1]} : vector<1x512xf32> to vector<1x256xf32>
    %13 = arith.mulf %12, %8 : vector<1x256xf32>
    %14 = vector.extract_strided_slice %5 {offsets = [0, 127], sizes = [1, 256], strides = [1, 1]} : vector<1x512xf32> to vector<1x256xf32>
    %15 = arith.mulf %14, %7 : vector<1x256xf32>
    %16 = vector.extract_strided_slice %5 {offsets = [0, 128], sizes = [1, 256], strides = [1, 1]} : vector<1x512xf32> to vector<1x256xf32>
    %17 = vector.extract_strided_slice %5 {offsets = [0, 129], sizes = [1, 256], strides = [1, 1]} : vector<1x512xf32> to vector<1x256xf32>
    %18 = arith.mulf %17, %8 : vector<1x256xf32>
    %19 = vector.extract_strided_slice %5 {offsets = [0, 143], sizes = [1, 256], strides = [1, 1]} : vector<1x512xf32> to vector<1x256xf32>
    %20 = arith.mulf %19, %7 : vector<1x256xf32>
    %21 = vector.extract_strided_slice %5 {offsets = [0, 144], sizes = [1, 256], strides = [1, 1]} : vector<1x512xf32> to vector<1x256xf32>
    %22 = vector.extract_strided_slice %5 {offsets = [0, 145], sizes = [1, 256], strides = [1, 1]} : vector<1x512xf32> to vector<1x256xf32>
    %23 = arith.mulf %22, %8 : vector<1x256xf32>
    %cst = arith.constant 1.000000e+00 : f32
    %24 = vector.broadcast %cst : f32 to vector<1x256xf32>
    %cst_3 = arith.constant 0.000000e+00 : f32
    %25 = vector.broadcast %cst_3 : f32 to vector<6x256xf32>
    %26 = tpu.concatenate %10, %11, %13, %15, %16, %18, %20, %21, %23, %24, %25 in 0 : vector<1x256xf32>, vector<1x256xf32>, vector<1x256xf32>, vector<1x256xf32>, vector<1x256xf32>, vector<1x256xf32>, vector<1x256xf32>, vector<1x256xf32>, vector<1x256xf32>, vector<1x256xf32>, vector<6x256xf32> -> vector<16x256xf32>
    %27 = arith.truncf %26 : vector<16x256xf32> to vector<16x256xbf16>
    %c0_4 = arith.constant 0 : index
    %c0_5 = arith.constant 0 : index
    %28 = vector.load %arg3[%c0_4, %c0_5] : memref<64x16xbf16, #tpu.memory_space<vmem>>, vector<64x16xbf16>
    %cst_6 = arith.constant dense<0.000000e+00> : vector<64x256xf32>
    %29 = tpu.matmul %28, %27, %cst_6 {dimension_numbers = #tpu.dot_dimension_numbers<[1], [0], [0], [1], [0, 0, 1, 1], [], []>} : vector<64x16xbf16>, vector<16x256xbf16>, vector<64x256xf32> -> vector<64x256xf32>
    %cst_7 = arith.constant 0.000000e+00 : f32
    %30 = vector.broadcast %cst_7 : f32 to vector<64x256xf32>
    %31 = arith.maximumf %29, %30 : vector<64x256xf32>
    %32 = vector.extract_strided_slice %5 {offsets = [0, 128], sizes = [1, 256], strides = [1, 1]} : vector<1x512xf32> to vector<1x256xf32>
    %33 = math.absf %32 : vector<1x256xf32>
    %cst_8 = arith.constant 0.000000e+00 : f32
    %34 = vector.broadcast %cst_8 : f32 to vector<1x256xf32>
    %35 = arith.cmpf ogt, %33, %34 : vector<1x256xf32>
    %cst_9 = arith.constant 0.000000e+00 : f32
    %36 = vector.shape_cast %35 : vector<1x256xi1> to vector<1x256xi1>
    %37 = vector.broadcast %36 : vector<1x256xi1> to vector<64x256xi1>
    %38 = vector.broadcast %cst_9 : f32 to vector<64x256xf32>
    %39 = arith.select %37, %31, %38 : vector<64x256xi1>, vector<64x256xf32>
    %c0_10 = arith.constant 0 : index
    %c0_11 = arith.constant 0 : index
    %c0_12 = arith.constant 0 : index
    %40 = vector.load %arg5[%c0_10, %c0_11, %c0_12] : memref<1x64x256xf32, #tpu.memory_space<vmem>>, vector<1x64x256xf32>
    %41 = vector.shape_cast %40 : vector<1x64x256xf32> to vector<64x256xf32>
    %42 = vector.shape_cast %39 : vector<64x256xf32> to vector<1x64x256xf32>
    tpu.vector_store %arg5[%c0_10, %c0_11, %c0_12], %42 {strides = array<i32>} : memref<1x64x256xf32, #tpu.memory_space<vmem>>, vector<1x64x256xf32>,
    return
  }
  func.func @transform_0(%arg0: i32, %arg1: i32) -> (i32, i32, i32) {
    %c0_i32 = arith.constant 0 : i32
    %c0_i32_0 = arith.constant 0 : i32
    %c0_i32_1 = arith.constant 0 : i32
    return %arg0, %c0_i32, %c0_i32_0 : i32, i32, i32
  }
  func.func @transform_1(%arg0: i32, %arg1: i32) -> (i32, i32) {
    %c0_i32 = arith.constant 0 : i32
    %c0_i32_0 = arith.constant 0 : i32
    %c0_i32_1 = arith.constant 0 : i32
    return %c0_i32, %c0_i32_0 : i32, i32
  }
  func.func @transform_2(%arg0: i32, %arg1: i32) -> (i32, i32) {
    %c0_i32 = arith.constant 0 : i32
    %c0_i32_0 = arith.constant 0 : i32
    return %c0_i32, %arg1 : i32, i32
  }
  func.func @transform_3(%arg0: i32, %arg1: i32) -> (i32, i32, i32) {
    %c0_i32 = arith.constant 0 : i32
    %c0_i32_0 = arith.constant 0 : i32
    return %arg0, %c0_i32, %arg1 : i32, i32, i32
  }
}

</mosaic_0001>

<bundles_post_ra>
// kernel: tpu_custom_call.1
= control target key start
LH: loop header
LB: loop body
LE: loop exit
PB: predicated region body
PF: predicated region fallthrough
CT: control target
= control target key end

     0   :  { %8 = vsyncpa [#allocation3], 0  ;;  %s1300_s0 = inlined_call_operand.vmem [shape: bf16[2,1,512], index: 0, kind: input, shape index: {}]   ;;  %s1301_s1 = inlined_call_operand.vmem [shape: bf16[64,16], index: 1, kind: input, shape index: {}]   ;;  %s1302_s2 = inlined_call_operand.vmem [shape: f32[2,256], index: 2, kind: input, shape index: {}]   ;;  %s1303_s3 = inlined_call_operand.hbm [shape: f32[2,64,256], index: 3, kind: output, shape index: {}]  }
   0x1   :  { %10 = vsyncpa [#allocation3 + $0x1], 0  ;;  %s1007_s12 = smov 0   ;;  %s1009_s13 = smov 0  }
   0x2   :  { %s1011_s14 = smov 0   ;;  %s1013_s15 = smov 0  }
   0x3   :  { %s1015_s16 = smov 0   ;;  %s1017_s17 = smov 0  }
   0x4 LB: > { %s763_s18 = sadd.s32 4294967295, %s974_s17   ;;  %s764_s19 = sadd.s32 4294967294, %s974_s17   ;;  %s974_s17 = sphi %s1017_s17, %s16_s17   ;;  %s970_s16 = sphi %s1015_s16, %s1310_s16   ;;  %s966_s15 = sphi %s1013_s15, %s1309_s15   ;;  %s962_s14 = sphi %s1011_s14, %s1308_s14   ;;  %s958_s13 = sphi %s1009_s13, %s1307_s13   ;;  %s954_s12 = sphi %s1007_s12, %s1306_s12  }
   0x5   : > { %s28_s20 = sadd.s32 1, %s970_s16  ;;  %s110_s21 = sadd.s32 1, %s962_s14 }
   0x6   : > { %p30_p0 = scmp.ge.s32.totalorder %s28_s20, 2  ;;  %p120_p1 = scmp.ne.s32.totalorder %s962_s14, %s958_s13 }
   0x7   : > { %p121_p2 = scmp.eq.s32.totalorder %s763_s18, 1  ;;  %p126_p3 = scmp.ne.s32.totalorder %s958_s13, %s954_s12 }
   0x8   : > { %s1312_s20 = smov (%p30_p0, %s28_s20), 0  ;;  %p127_p5 = scmp.eq.s32.totalorder %s764_s19, 1 }
   0x9   : > { %p1047_p4 = por %p121_p2, %p120_p1  ;;  %s105_s23 = ssub.s32 %s970_s16, %s1312_s20 }
   0xa   : > { %p768_p6 = scmp.ge.s32.totalorder %s974_s17, 1  ;;  %p108_p7 = scmp.eq.s32.totalorder %s105_s23, 0 }
   0xb   : > { %p1054_p8 = por %p127_p5, %p126_p3  ;;  %p164_p9 = scmp.lt.s32.totalorder %s974_s17, 3 }
   0xc   : > { %s1060_s25 = scalar_select %p108_p7, %s962_s14, %s110_s21  }
   0xd   : > { %p165_p10 = pnand %p768_p6, %p164_p9 }
   0xe   : > { %v1065_v0 = vld [vmem:[%s1302_s2] sm:$0xf] (!%p165_p10)  ;;  %v259_v1 = vlaneseq (!%p165_p10)  ;;  %s976_s28 = smov (!%p165_p10), 127   ;;  %p192_p11 = scmp.lt.s32.totalorder (!%p165_p10), %s966_s15, 1  ;;  %vm231_vm0 = vcmask (!%p165_p10), 1039360   ;;  %vm224_vm1 = vcmask (!%p165_p10), 924672  }
   0xf   : > { %168 = sbr.rel (%p165_p10) target bundleno = 646 (0x286), region = 32  ;;  %228 = vrot.lane.b32.xlu0 (!%p165_p10), %v1065_v0, %s976_s28  ;;  %v219_v2 = vrot.slane (!%p165_p10), %v1065_v0, 7  ;;  %s977_s30 = smov (!%p165_p10), 113   ;;  %vm215_vm2 = vcmask (!%p165_p10), 908288   ;;  %vm422_vm3 = vcmask (!%p165_p10), 1040384   ;;  %vm426_vm4 = vcmask (!%p165_p10), 1041408  }
  0x10   : > { %v1070_v3 = vshrl.u32 (!%p165_p10), %v259_v1, 7  ;;  %s978_s8 = smov (!%p165_p10), 111   ;;  %s979_s9 = smov (!%p165_p10), 112   ;;  %vm316_vm5 = vcmask (!%p165_p10), 1031168   ;;  %vm341_vm6 = vcmask (!%p165_p10), 916480   ;;  %vm430_vm7 = vcmask (!%p165_p10), 1042432  }
  0x11   : > { %v220_v4 = vrot.slane (!%p165_p10), %v219_v2, 2  ;;  %s980_s10 = smov (!%p165_p10), 126   ;;  %s981_s11 = smov (!%p165_p10), 95   ;;  %vm434_vm8 = vcmask (!%p165_p10), 1043456   ;;  %vm438_vm9 = vcmask (!%p165_p10), 1044480   ;;  %vm442_vm10 = vcmask (!%p165_p10), 1045504  }
  0x12   : > { %v1077_v5 = vsub.s32 (!%p165_p10), 2, %v1070_v3  ;;  %v1080_v6 = vsub.s32 (!%p165_p10), 4, %v1070_v3  ;;  %v1093_v12 = vsub.s32 (!%p165_p10), 0, %v1070_v3  ;;  %v391_v53 = vsub.s32 (!%p165_p10), 6, %v1070_v3  ;;  %s983_s18 = smov (!%p165_p10), 17   ;;  %s984_s19 = smov (!%p165_p10), [#allocation2]  }
  0x13   : > { %221 = vrot.lane.b32.xlu0 (!%p165_p10), %v220_v4, %s977_s30  ;;  %vm399_vm11 = vcmask (!%p165_p10), 777216   ;;  %vm446_vm12 = vcmask (!%p165_p10), 1046528   ;;  %vm496_vm13 = vcmask (!%p165_p10), 138240   ;;  %vm501_vm14 = vcmask (!%p165_p10), 130048   ;;  %s900_s21 = sshll.u32 (!%p165_p10), %s984_s19, 4  ;;  %s901_s21 = int_to_ptr.vmem [resolvable:$false] %s900_s21 }
  0x14   : > { %s902_s23 = scalar_lea.vmem (!%p165_p10), %s901_s21, 4096 }
  0x16   : > { %s193_s29 = scalar_select %p192_p11, %s966_s15, 1 }
  0x18   : > { %s770_s4 = sshll.u32 %s193_s29, 2 }
  0x19   : > { %s195_s7 = scalar_lea.vmem %s1300_s0, %s770_s4  ;;  %s189_s4 = sand.u32 1, %s958_s13  }
  0x1a   : > { %v208_v7 = vld [vmem:[%s195_s7] sm:$0xf]  ;;  %s769_s5 = sshll.u32 %s189_s4, 7  ;;  %s784_s7 = sshll.u32 %s966_s15, 11 }
  0x1b   : > { %v1082_v8 = vunpack.c.l.bf16 %v208_v7  ;;  %s1197_s6 = scalar_lea.vmem [#allocation2], %s769_s5 }
  0x1d   : > { %236 = vrot.lane.b32.xlu1 %v1082_v8, %s976_s28  ;;  %251 = vrot.lane.b32.xlu0 %v1082_v8, %s978_s8  ;;  %v281_v9 = vrot.slane %v1082_v8, %v1077_v5  ;;  %v285_v10 = vrot.slane %v1082_v8, %v1080_v6  ;;  %v277_v13 = vrot.slane %v1082_v8, %v1093_v12 }
  0x1e   : > { %v392_v55 = vrot.slane %v1082_v8, %v391_v53 }
  0x1f   : > { %v852_v11 = vpack.i.bf16 %v285_v10, %v281_v9 }
  0x21   : > { %244 = vrot.lane.b32.xlu1 %v1082_v8, %s977_s30  ;;  %853 = vrot.lane.b32.xlu0 %v852_v11, %s976_s28 }
  0x25   : > { %212 = vrot.lane.b32.xlu1 %v1065_v0, %s978_s8  ;;  %858 = vrot.lane.b32.xlu0 %v852_v11, %s978_s8 }
  0x29   : > { %286 = vrot.lane.b32.xlu1 %v277_v13, %s976_s28 }
  0x81   : > { %v229_v14 = vpop.permute.xlu0 %228 }
  0x82   : > { %v230_v15 = vrot.slane %v229_v14, 6 }
  0x84   : > { %v232_v16 = vsel %vm231_vm0, %v230_v15, %v229_v14 }
  0x85   : > { %v234_v17 = vmul.f32 %v232_v16, %v1082_v8  ;;  %v222_v18 = vpop.permute.xlu0 %221 }
  0x86   : > { %v223_v19 = vrot.slane %v222_v18, 6 }
  0x87   : > { %v330_v20 = vrot.slane %v234_v17, %v1077_v5  ;;  %v334_v21 = vrot.slane %v234_v17, %v1080_v6  ;;  %v326_v22 = vrot.slane %v234_v17, %v1093_v12 }
  0x88   : > { %v225_v23 = vsel %vm224_vm1, %v223_v19, %v222_v18 }
  0x89   : > { %v227_v24 = vmul.f32 %v225_v23, %v1082_v8  ;;  %v862_v25 = vpack.i.bf16 %v334_v21, %v330_v20  ;;  %335 = vrot.lane.b32.xlu1 %v326_v22, %s979_s9 }
  0x8b   : > { %863 = vrot.lane.b32.xlu0 %v862_v25, %s979_s9  ;;  %v305_v32 = vrot.slane %v227_v24, %v1077_v5  ;;  %v309_v33 = vrot.slane %v227_v24, %v1080_v6  ;;  %v301_v34 = vrot.slane %v227_v24, %v1093_v12 }
  0x8d   : > { %v867_v40 = vpack.i.bf16 %v309_v33, %v305_v32  ;;  %310 = vrot.lane.b32.xlu1 %v301_v34, %s980_s10 }
  0x8f   : > { %v237_v26 = vpop.permute.xlu1 %236  ;;  %v252_v27 = vpop.permute.xlu0 %251  ;;  %868 = vrot.lane.b32.xlu0 %v867_v40, %s980_s10  ;;  %s1234_s10 = scalar_lea.hbm %s1303_s3, %s784_s7 }
  0x90   : > { %v238_v28 = vrot.slane %v237_v26, 2  ;;  %v239_v29 = vrot.slane %v237_v26, 4  ;;  %v253_v30 = vrot.slane %v252_v27, 2  ;;  %v254_v31 = vrot.slane %v252_v27, 4 }
  0x92   : > { %v240_v35 = vsel %vm231_vm0, %v238_v28, %v239_v29  ;;  %v255_v36 = vsel %vm215_vm2, %v253_v30, %v254_v31 }
  0x93   : > { %v243_v37 = vmul.f32 %v240_v35, %v220_v4  ;;  %v245_v38 = vpop.permute.xlu1 %244  ;;  %v257_v39 = vmul.f32 %v255_v36, %v220_v4  ;;  %v854_v57 = vpop.permute.xlu0 %853 }
  0x94   : > { %v246_v41 = vrot.slane %v245_v38, 2  ;;  %v247_v42 = vrot.slane %v245_v38, 4  ;;  %v855_v1 = vunpack.i.l.bf16 %v854_v57 }
  0x95   : > { %v359_v43 = vrot.slane %v243_v37, %v1093_v12  ;;  %v363_v44 = vrot.slane %v243_v37, %v1077_v5  ;;  %v409_v45 = vrot.slane %v257_v39, %v1093_v12  ;;  %v413_v46 = vrot.slane %v257_v39, %v1077_v5 }
  0x96   : > { %v248_v47 = vsel %vm224_vm1, %v246_v41, %v247_v42 }
  0x97   : > { %v250_v48 = vmul.f32 %v248_v47, %v1065_v0  ;;  %v872_v49 = vpack.i.bf16 %v363_v44, %v359_v43  ;;  %v887_v52 = vpack.i.bf16 %v413_v46, %v409_v45  ;;  %v213_v56 = vpop.permute.xlu1 %212  ;;  %v859_v60 = vpop.permute.xlu0 %858  ;;  %v856_v0 = vunpack.i.h.bf16 %v854_v57 }
  0x98   : > { %v214_v58 = vrot.slane %v213_v56, 6  ;;  %v861_v22 = vunpack.i.h.bf16 %v859_v60  ;;  %v860_v23 = vunpack.i.l.bf16 %v859_v60 }
  0x99   : > { %873 = vrot.lane.b32.xlu1 %v872_v49, %s978_s8  ;;  %v376_v50 = vrot.slane %v250_v48, %v1093_v12  ;;  %v380_v51 = vrot.slane %v250_v48, %v1077_v5  ;;  %v293_v9 = vsel %vm231_vm0, %v855_v1, %v856_v0 }
  0x9a   : > { %v216_v61 = vsel %vm215_vm2, %v214_v58, %v213_v56  ;;  %v351_v34 = vsel %vm215_vm2, %v860_v23, %v861_v22 }
  0x9b   : > { %v877_v54 = vpack.i.bf16 %v380_v51, %v376_v50  ;;  %v287_v59 = vpop.permute.xlu1 %286  ;;  %v218_v63 = vmul.f32 %v216_v61, %v1082_v8 }
  0x9c   : > { %v292_v13 = vsel %vm231_vm0, %v287_v59, %v855_v1 }
  0x9d   : > { %878 = vrot.lane.b32.xlu0 %v877_v54, %s978_s8  ;;  %888 = vrot.lane.b32.xlu1 %v887_v52, %s978_s8  ;;  %v266_v3 = vrot.slane %v218_v63, %v1077_v5  ;;  %v270_v4 = vrot.slane %v218_v63, %v1080_v6  ;;  %v262_v10 = vrot.slane %v218_v63, %v1093_v12  ;;  %v982_v63 = vmov 0   ;;  %s674_s8 = sshll.u32 %s1197_s6, 4  ;;  %s1236_s8 = int_to_ptr.vmem [resolvable:$true] %s674_s8 }
  0x9e   : > { %546 = vmatprep.mubr.bf16.mxu0 %v982_v63  ;;  %566 = vmatprep.mubr.bf16.mxu1 %v982_v63  ;;  %p903_p1 = scmp.lt.s32.totalorder %s1236_s8, %s901_s21 }
  0x9f   : > { %v425_v16 = vsel %vm422_vm3, %v270_v4, %v856_v0  ;;  %v424_v17 = vsel %vm422_vm3, %v266_v3, %v293_v9  ;;  %v423_v24 = vsel %vm422_vm3, %v262_v10, %v292_v13 }
  0xa1   : > { %883 = vrot.lane.b32.xlu0 %v852_v11, %s981_s11  ;;  %397 = vrot.lane.b32.xlu1 %v392_v55, %s981_s11  ;;  %s1254_s11 = scalar_lea.sflag [#allocation3], %s189_s4 }
  0xfb   : > { %v336_v62 = vpop.permute.xlu1 %335 }
  0xfd   : > { %v864_v2 = vpop.permute.xlu0 %863 }
  0xfe   : > { %v866_v18 = vunpack.i.h.bf16 %v864_v2  ;;  %v865_v6 = vunpack.i.l.bf16 %v864_v2 }
  0xff   : > { %v311_v7 = vpop.permute.xlu1 %310 }
 0x100   : > { %v343_v28 = vsel %vm341_vm6, %v865_v6, %v866_v18  ;;  %v342_v32 = vsel %vm341_vm6, %v336_v62, %v865_v6  ;;  %v893_v6 = vld [vmem:[%s1301_s1 + $0x10] sm:$0xff]  }
 0x101   : > { %v869_v11 = vpop.permute.xlu0 %868 }
 0x102   : > { %v871_v14 = vunpack.i.h.bf16 %v869_v11  ;;  %v870_v15 = vunpack.i.l.bf16 %v869_v11 }
 0x104   : > { %v429_v19 = vsel %vm426_vm4, %v425_v16, %v871_v14  ;;  %v318_v20 = vsel %vm316_vm5, %v870_v15, %v871_v14  ;;  %v317_v21 = vsel %vm316_vm5, %v311_v7, %v870_v15 }
 0x105   : > { %v428_v25 = vsel %vm426_vm4, %v424_v17, %v318_v20  ;;  %v427_v27 = vsel %vm426_vm4, %v423_v24, %v317_v21  ;;  %v433_v29 = vsel %vm430_vm7, %v429_v19, %v866_v18  ;;  %v892_v18 = vld [vmem:[%s1301_s1] sm:$0xff]   ;;  %v894_v19 = vld [vmem:[%s1301_s1 + $0x8] sm:$0xff]   ;;  %v895_v20 = vld [vmem:[%s1301_s1 + $0x18] sm:$0xff]   ;;  %v603_v21 = vrot.slane %v1082_v8, 2 }
 0x106   : > { %v432_v33 = vsel %vm430_vm7, %v428_v25, %v343_v28  ;;  %v431_v35 = vsel %vm430_vm7, %v427_v27, %v342_v32  ;;  %v437_v38 = vsel %vm434_vm8, %v433_v29, %v861_v22 }
 0x107   : > { %v436_v42 = vsel %vm434_vm8, %v432_v33, %v351_v34  ;;  %v435_v46 = vsel %vm434_vm8, %v431_v35, %v860_v23  ;;  %v605_v22 = vand.u32 2147483647, %v603_v21 }
 0x109   : > { %vm606_vm15 = vcmp.gt.f32.partialorder %v605_v22, 0.0 }
 0x10a   : > { %v607_v23 = vsel %vm606_vm15, 1, %v982_v63 }
 0x10b   : > { %v874_v26 = vpop.permute.xlu1 %873  ;;  %v611_v24 = vrot.slane %v607_v23, %v1093_v12  ;;  %v615_v25 = vrot.slane %v607_v23, %v1077_v5 }
 0x10c   : > { %v876_v30 = vunpack.i.h.bf16 %v874_v26  ;;  %v875_v31 = vunpack.i.l.bf16 %v874_v26 }
 0x10d   : > { %v1184_v26 = vrot.slane %v611_v24, %v1093_v12  ;;  %v1187_v27 = vrot.slane %v615_v25, %v1093_v12 }
 0x10e   : > { %v368_v43 = vsel %vm215_vm2, %v875_v31, %v876_v30  ;;  %v441_v47 = vsel %vm438_vm9, %v437_v38, %v876_v30  ;;  %v439_v0 = vsel %vm438_vm9, %v435_v46, %v875_v31 }
 0x10f   : > { %v879_v36 = vpop.permute.xlu0 %878  ;;  %v889_v37 = vpop.permute.xlu1 %888  ;;  %v440_v52 = vsel %vm438_vm9, %v436_v42, %v368_v43  ;;  %vm624_vm0 = vcmp.eq.s32.totalorder %v1184_v26, 1  ;;  %vm625_vm1 = vcmp.eq.s32.totalorder %v1187_v27, 1 }
 0x110   : > { %v881_v39 = vunpack.i.h.bf16 %v879_v36  ;;  %v880_v40 = vunpack.i.l.bf16 %v879_v36  ;;  %v891_v41 = vunpack.i.h.bf16 %v889_v37  ;;  %v890_v44 = vunpack.i.l.bf16 %v889_v37 }
 0x112   : > { %v452_v45 = vsel %vm422_vm3, %v891_v41, 1.0  ;;  %v385_v48 = vsel %vm215_vm2, %v880_v40, %v881_v39  ;;  %v418_v49 = vsel %vm215_vm2, %v890_v44, %v891_v41  ;;  %v445_v57 = vsel %vm442_vm10, %v441_v47, %v881_v39 }
 0x113   : > { %v884_v50 = vpop.permute.xlu0 %883  ;;  %v398_v51 = vpop.permute.xlu1 %397  ;;  %v451_v55 = vsel %vm422_vm3, %v418_v49, 1.0  ;;  %v455_v56 = vsel %vm426_vm4, %v452_v45, 0.0  ;;  %v450_v59 = vsel %vm422_vm3, %v890_v44, 1.0  ;;  %v444_v62 = vsel %vm442_vm10, %v440_v52, %v385_v48 }
 0x114   : > { %v886_v53 = vunpack.i.h.bf16 %v884_v50  ;;  %v885_v54 = vunpack.i.l.bf16 %v884_v50  ;;  %v454_v58 = vsel %vm426_vm4, %v451_v55, 0.0  ;;  %v443_v3 = vsel %vm442_vm10, %v439_v0, %v880_v40 }
 0x115   : > { %v453_v9 = vsel %vm426_vm4, %v450_v59, 0.0 }
 0x116   : > { %v400_v60 = vsel %vm399_vm11, %v885_v54, %v886_v53  ;;  %v401_v61 = vsel %vm399_vm11, %v886_v53, %v398_v51  ;;  %v447_v10 = vsel %vm446_vm12, %v443_v3, %v885_v54 }
 0x117   : > { %v449_v1 = vsel %vm446_vm12, %v445_v57, %v401_v61  ;;  %v448_v2 = vsel %vm446_vm12, %v444_v62, %v400_v60  ;;  %v456_v11 = vpack.c.bf16 %v453_v9, %v447_v10 }
 0x118   : > { %v458_v4 = vpack.c.bf16 %v455_v56, %v449_v1  ;;  %v457_v7 = vpack.c.bf16 %v454_v58, %v448_v2 }
 0x11a   : > { %494 = vrot.lane.b32.xlu1 %v458_v4, %s983_s18  ;;  %492 = vrot.lane.b32.xlu0 %v457_v7, %s983_s18 }
 0x11e   : > { %490 = vrot.lane.b32.xlu0 %v456_v11, %s983_s18  ;;  %s896_s18 = scalar_lea.vmem %s1236_s8, 2048 }
 0x11f   : > { %p897_p12 = scmp.ne.s32.totalorder %s1236_s8, %s896_s18  ;;  %p904_p2 = scmp.lt.s32.totalorder %s902_s23, %s896_s18 }
 0x121   : > { %p898_p13 = pnand %p897_p12, %p1047_p4  ;;  %p905_p3 = por %p904_p2, %p903_p1 }
 0x123   : > { %p899_p0 = pneg %p898_p13 }
 0x125   : > { %p906_p5 = pnand %p905_p3, %p899_p0 }
 0x18c   : > { %v495_v13 = vpop.permute.xlu1 %494  ;;  %v493_v14 = vpop.permute.xlu0 %492 }
 0x18d   : > { %v498_v15 = vsel %vm496_vm13, %v493_v14, %v495_v13 }
 0x18e   : > { %514 = vmatprep.subr.bf16.mxu0 %v498_v15  ;;  %785 = vmatprep.subr.bf16.mxu1 %v498_v15 }
 0x190   : > { %v491_v16 = vpop.permute.xlu0 %490 }
 0x191   : > { %v497_v17 = vsel %vm496_vm13, %v491_v16, %v493_v14 }
 0x192   : > { %515 = vmatpush1.bf16.msra.mxu0 %v497_v17  ;;  %786 = vmatpush1.bf16.msra.mxu1 %v497_v17 }
 0x195   : > { %775 = vmatmul.mubr.msk.bf16.vlgmr.msra.gmra.mrb[0].mxu0 %vm501_vm14, %v892_v18  ;;  %777 = vmatmul.mubr.msk.bf16.vlgmr.msra.gmra.mrb[0].mxu1 %vm501_vm14, %v893_v6 }
 0x196   : > { %556 = vmatprep.mubr.bf16.mxu0 %v982_v63  ;;  %576 = vmatprep.mubr.bf16.mxu1 %v982_v63 }
 0x19d   : > { %776 = vmatmul.mubr.msk.bf16.gmra.mrb[4].mxu0 %vm501_vm14, %v894_v19  ;;  %778 = vmatmul.mubr.msk.bf16.gmra.mrb[4].mxu1 %vm501_vm14, %v895_v20 }
 0x268   : > { %v548_v28 = vpop.f32.mrb[0].mxu0  ;;  %v568_v8 = vpop.f32.mrb[0].mxu1 }
 0x269   : > { %v587_v29 = vmax.f32 %v548_v28, 0.0  ;;  %v595_v30 = vmax.f32 %v568_v8, 0.0  ;;  %v550_v31 = vpop.f32.mrb[1].mxu0  ;;  %v570_v32 = vpop.f32.mrb[1].mxu1 }
 0x26a   : > { %v588_v5 = vmax.f32 %v550_v31, 0.0  ;;  %v596_v33 = vmax.f32 %v570_v32, 0.0  ;;  %v552_v34 = vpop.f32.mrb[2].mxu0  ;;  %v572_v35 = vpop.f32.mrb[2].mxu1 }
 0x26b   : > { %v626_v12 = vsel %vm624_vm0, %v587_v29, 0.0  ;;  %v634_v36 = vsel %vm624_vm0, %v595_v30, 0.0  ;;  %v589_v37 = vmax.f32 %v552_v34, 0.0  ;;  %v597_v38 = vmax.f32 %v572_v35, 0.0  ;;  %v554_v39 = vpop.f32.mrb[3].mxu0  ;;  %v574_v40 = vpop.f32.mrb[3].mxu1 }
 0x26c   : > { %642 = vst [vmem:[%s1197_s6] sm:$0xff] %v626_v12  ;;  %650 = vst [vmem:[%s1197_s6 + $0x40] sm:$0xff] %v634_v36  ;;  %v627_v41 = vsel %vm625_vm1, %v588_v5, 0.0  ;;  %v635_v42 = vsel %vm625_vm1, %v596_v33, 0.0  ;;  %v590_v43 = vmax.f32 %v554_v39, 0.0  ;;  %v598_v44 = vmax.f32 %v574_v40, 0.0 }
 0x26d   : > { %643 = vst [vmem:[%s1197_s6 + $0x8] sm:$0xff] %v627_v41  ;;  %651 = vst [vmem:[%s1197_s6 + $0x48] sm:$0xff] %v635_v42  ;;  %v628_v45 = vsel %vm624_vm0, %v589_v37, 0.0  ;;  %v636_v46 = vsel %vm624_vm0, %v597_v38, 0.0 }
 0x26e   : > { %644 = vst [vmem:[%s1197_s6 + $0x10] sm:$0xff] %v628_v45  ;;  %652 = vst [vmem:[%s1197_s6 + $0x50] sm:$0xff] %v636_v46  ;;  %v629_v47 = vsel %vm625_vm1, %v590_v43, 0.0  ;;  %v637_v48 = vsel %vm625_vm1, %v598_v44, 0.0 }
 0x26f   : > { %645 = vst [vmem:[%s1197_s6 + $0x18] sm:$0xff] %v629_v47  ;;  %653 = vst [vmem:[%s1197_s6 + $0x58] sm:$0xff] %v637_v48 }
 0x270   : > { %v558_v49 = vpop.f32.mrb[4].mxu0  ;;  %v578_v50 = vpop.f32.mrb[4].mxu1 }
 0x271   : > { %v591_v51 = vmax.f32 %v558_v49, 0.0  ;;  %v599_v52 = vmax.f32 %v578_v50, 0.0  ;;  %v560_v53 = vpop.f32.mrb[5].mxu0  ;;  %v580_v54 = vpop.f32.mrb[5].mxu1 }
 0x272   : > { %v592_v55 = vmax.f32 %v560_v53, 0.0  ;;  %v600_v56 = vmax.f32 %v580_v54, 0.0  ;;  %v562_v57 = vpop.f32.mrb[6].mxu0  ;;  %v582_v58 = vpop.f32.mrb[6].mxu1 }
 0x273   : > { %v630_v59 = vsel %vm624_vm0, %v591_v51, 0.0  ;;  %v638_v60 = vsel %vm624_vm0, %v599_v52, 0.0  ;;  %v593_v61 = vmax.f32 %v562_v57, 0.0  ;;  %v601_v62 = vmax.f32 %v582_v58, 0.0  ;;  %v564_v63 = vpop.f32.mrb[7].mxu0  ;;  %v584_v0 = vpop.f32.mrb[7].mxu1 }
 0x274   : > { %646 = vst [vmem:[%s1197_s6 + $0x20] sm:$0xff] %v630_v59  ;;  %654 = vst [vmem:[%s1197_s6 + $0x60] sm:$0xff] %v638_v60  ;;  %v631_v1 = vsel %vm625_vm1, %v592_v55, 0.0  ;;  %v639_v2 = vsel %vm625_vm1, %v600_v56, 0.0  ;;  %v594_v3 = vmax.f32 %v564_v63, 0.0  ;;  %v602_v4 = vmax.f32 %v584_v0, 0.0 }
 0x275   : > { %647 = vst [vmem:[%s1197_s6 + $0x28] sm:$0xff] %v631_v1  ;;  %655 = vst [vmem:[%s1197_s6 + $0x68] sm:$0xff] %v639_v2  ;;  %v632_v7 = vsel %vm624_vm0, %v593_v61, 0.0  ;;  %v640_v9 = vsel %vm624_vm0, %v601_v62, 0.0 }
 0x276   : > { %648 = vst [vmem:[%s1197_s6 + $0x30] sm:$0xff] %v632_v7  ;;  %656 = vst [vmem:[%s1197_s6 + $0x70] sm:$0xff] %v640_v9  ;;  %v633_v10 = vsel %vm625_vm1, %v594_v3, 0.0  ;;  %v641_v11 = vsel %vm625_vm1, %v602_v4, 0.0 }
 0x277   : > { %649 = vst [vmem:[%s1197_s6 + $0x38] sm:$0xff] %v633_v10  ;;  %657 = vst [vmem:[%s1197_s6 + $0x78] sm:$0xff] %v641_v11 }
 0x278   : > { %909 = shalt.err (!%p906_p5)
}
 0x279   : > { %s910_s26 = scalar_lea.hbm %s1234_s10, 2048  ;;  %s914_s29 = scalar_lea.hbm %s1303_s3, 4096 }
 0x27a   : > { %p911_p6 = scmp.ne.s32.totalorder %s1234_s10, %s910_s26  ;;  %p915_p10 = scmp.lt.u32.totalorder %s1234_s10, %s1303_s3 }
 0x27b   : > { %p916_p11 = scmp.lt.u32.totalorder %s914_s29, %s910_s26  ;;  %p918_p13 = scmp.lt.u32.totalorder %s910_s26, %s1234_s10 }
 0x27c   : > { %p912_p7 = pnand %p911_p6, %p1047_p4 }
 0x27d   : > { %p917_p12 = por %p916_p11, %p915_p10 }
 0x27e   : > { %p913_p9 = pneg %p912_p7 }
 0x27f   : > { %p919_p0 = por %p918_p13, %p917_p12 }
 0x281   : > { %p920_p1 = pnand %p919_p0, %p913_p9 }
 0x283   : > { %923 = shalt.err (!%p920_p1)
}
 0x284   : > { %s985_s5 = smov 256   ;;  %s986_s6 = smov 16  }
 0x285   : > { %787 = dma.vmem_to_hbm [thread:$0]  (%p1047_p4), %s1236_s8, 2048, %s1234_s10, %s1254_s11, %s985_s5, %s985_s5, %s986_s6  }
 0x286 PF: > { %p793_p2 = scmp.ge.s32.totalorder %s974_s17, 2  ;;  %s689_s7 = sand.u32 1, %s954_s12  }
 0x287   : > { %s690_s15 = scalar_lea.sflag [#allocation3], %s689_s7 }
 0x288   : > { %p790_p3 = pnand %p793_p2, %p1054_p8 }
 0x28a   : > { %949 = dma.done.wait (!%p790_p3), %s690_s15, 2048  }
 0x28b   : > { %951 = vsyncadd (!%p790_p3), %s690_s15, 4294965248  ;;  %s16_s17 = sadd.s32 1, %s974_s17   ;;  %s1306_s12 = smov %s958_s13 }
 0x28c   : > { %p13_p5 = scmp.ge.s32.totalorder %s16_s17, 4   ;;  %s1307_s13 = smov %s962_s14 }
 0x28d   : > { %s1308_s14 = smov %s1060_s25  ;;  %s1309_s15 = smov %s970_s16 }
 0x28e   : > { %s1310_s16 = smov %s1312_s20  ;;  %15 = sbr.rel (!%p13_p5) target bundleno = 4 (0x4), region = 71 }
 0x295   :  { %695 = vsyncpa [#allocation3], 1 }
 0x296   :  { %697 = vsyncpa [#allocation3 + $0x1], 1 }

</bundles_post_ra>
